<compile_context>
chip_gen: v5e
topology: v5e:2x2
jax: 0.10.0
libtpu: 0.0.40
codegen_flags: <defaults>
</compile_context>

<pallas_src>
import functools

import jax
import jax.numpy as jnp
from jax import lax
from jax.experimental import pallas as pl
from jax.experimental.pallas import tpu as pltpu


def _attention_kernel(q_ref, k_ref, v_ref, wq_ref, wk_ref, wv_ref, o_ref,
                      q_acc, out_acc,
                      *, d_head: int, tk: int, masked: bool, mxu_dtype):
    j = pl.program_id(0)
    nk = pl.num_programs(0)

    @pl.when(j == 0)
    def _init():
        # Q projection once for the whole grid; fold the softmax scale into Q
        # ([S, Dp] multiplies instead of [S, S] on the hot score path).
        scale = 1.0 / (float(d_head) ** 0.5)
        q_acc[...] = jnp.dot(q_ref[...], wq_ref[...],
                             preferred_element_type=jnp.float32) * scale
        out_acc[...] = jnp.zeros_like(out_acc)

    # K/V projections for this key tile (MXU, f32 accumulation).
    K = jnp.dot(k_ref[...], wk_ref[...], preferred_element_type=jnp.float32)
    V = jnp.dot(v_ref[...], wv_ref[...], preferred_element_type=jnp.float32)

    Q = q_acc[...]
    if mxu_dtype != jnp.float32:
        # bf16 inputs: feed the score / PV matmuls in bf16 (2x MXU throughput
        # on v6e/v7x); softmax math stays f32 below.
        Q = Q.astype(mxu_dtype)
        K = K.astype(mxu_dtype)
        V = V.astype(mxu_dtype)

    # scores[i, c] = <Q[i], K[c]> — contract last dims directly, no K.T.
    scores = lax.dot_general(Q, K, (((1,), (1,)), ((), ())),
                             preferred_element_type=jnp.float32)

    if masked:
        s_q = scores.shape[0]
        row = lax.broadcasted_iota(jnp.int32, (s_q, tk), 0)
        col = lax.broadcasted_iota(jnp.int32, (s_q, tk), 1) + j * tk
        # Large finite negative instead of -inf avoids NaN hazards in exp().
        scores = jnp.where(col > row, -1e30, scores)

    # softmax over the QUERY axis (dim=-2), per key column.  The full query
    # extent is resident, so this is exact within a single key tile.
    m = jnp.max(scores, axis=0, keepdims=True)
    e = jnp.exp(scores - m)
    denom = jnp.sum(e, axis=0, keepdims=True)
    probs = e * pl.reciprocal(denom, approx=True)

    out_acc[...] += jnp.dot(probs.astype(V.dtype), V,
                            preferred_element_type=jnp.float32)

    @pl.when(j == nk - 1)
    def _finalize():
        o_ref[...] = out_acc[...].astype(o_ref.dtype)


def _pick_key_tile(s: int, target: int) -> int:
    for t in (target, 256, 128, 64, 32, 16, 8):
        if t <= s and s % t == 0:
            return t
    return s


def attention(q, k, v, wq_t, wk_t, wv_t, *, d_head: int, masked: bool = False,
              block_k: int = 512):
    """q,k,v: [S, d_model]; wq_t/wk_t/wv_t: [d_model, d_head] (pre-transposed)."""
    S, d_model = q.shape
    assert k.shape[0] == S and v.shape[0] == S, "module assumes square scores"

    # Pad the head dim to a full 128-lane width: lane-dense MXU feeds and
    # unmasked output stores.  Zero weight columns do not change Q.K^T, and
    # the zero output columns are sliced off below.
    Dp = ((d_head + 127) // 128) * 128

    def pad_w(w):
        return jnp.pad(w, ((0, 0), (0, Dp - w.shape[1])))

    wq_p, wk_p, wv_p = pad_w(wq_t), pad_w(wk_t), pad_w(wv_t)

    tk = _pick_key_tile(S, block_k)   # default 512: sized for v7x 64 MiB VMEM
    nk = S // tk

    mxu_dtype = jnp.bfloat16 if q.dtype == jnp.bfloat16 else jnp.float32

    kernel = functools.partial(_attention_kernel, d_head=d_head, tk=tk,
                               masked=masked, mxu_dtype=mxu_dtype)

    itemsize = q.dtype.itemsize
    cost = pl.CostEstimate(
        flops=2 * S * d_model * Dp * 3 + 4 * S * S * Dp,
        transcendentals=S * S,
        bytes_accessed=(3 * S * d_model + 3 * d_model * Dp + S * Dp) * itemsize,
    )

    grid_spec = pltpu.PrefetchScalarGridSpec(
        num_scalar_prefetch=0,
        grid=(nk,),
        in_specs=[
            pl.BlockSpec((S, d_model), lambda j: (0, 0)),    # q: resident
            pl.BlockSpec((tk, d_model), lambda j: (j, 0)),   # k: key tiles
            pl.BlockSpec((tk, d_model), lambda j: (j, 0)),   # v: key tiles
            pl.BlockSpec((d_model, Dp), lambda j: (0, 0)),   # Wq: resident
            pl.BlockSpec((d_model, Dp), lambda j: (0, 0)),   # Wk: resident
            pl.BlockSpec((d_model, Dp), lambda j: (0, 0)),   # Wv: resident
        ],
        out_specs=pl.BlockSpec((S, Dp), lambda j: (0, 0)),   # resident accumulator
        scratch_shapes=[
            pltpu.VMEM((S, Dp), jnp.float32),   # scaled Q
            pltpu.VMEM((S, Dp), jnp.float32),   # output accumulator
        ],
    )

    out_padded = pl.pallas_call(
        kernel,
        out_shape=jax.ShapeDtypeStruct((S, Dp), q.dtype),
        grid_spec=grid_spec,
        compiler_params=pltpu.CompilerParams(
            # key axis is a reduction into the resident output block
            dimension_semantics=("arbitrary",),
            vmem_limit_bytes=48 * 1024 * 1024,
        ),
        cost_estimate=cost,
    )(q, k, v, wq_p, wk_p, wv_p)

    return out_padded[:, :d_head]


def _reference(q, k, v, wq_t, wk_t, wv_t, *, d_head, masked):
    Q = q @ wq_t
    K = k @ wk_t
    V = v @ wv_t
    scores = (Q @ K.T) / (float(d_head) ** 0.5)
    if masked:
        s = scores.shape[0]
        mask = jnp.triu(jnp.ones((s, s), dtype=bool), k=1)
        scores = jnp.where(mask, -jnp.inf, scores)
    probs = jax.nn.softmax(scores, axis=-2)
    return probs @ V


if __name__ == "__main__":
    d_model = 32
    d_head = 8

    key = jax.random.PRNGKey(0)
    kq, kk, kv, kwq, kwk, kwv = jax.random.split(key, 6)

    # nn.Linear(d_model, d_head) weights are (d_head, d_model); init like
    # PyTorch's uniform(-1/sqrt(d_model), 1/sqrt(d_model)), then pre-transpose.
    bound = 1.0 / (d_model ** 0.5)
    wq = jax.random.uniform(kwq, (d_head, d_model), jnp.float32, -bound, bound)
    wk = jax.random.uniform(kwk, (d_head, d_model), jnp.float32, -bound, bound)
    wv = jax.random.uniform(kwv, (d_head, d_model), jnp.float32, -bound, bound)
    wq_t, wk_t, wv_t = wq.T, wk.T, wv.T

    # --- small shape matching the module spec (S=8), masked and unmasked ---
    S = 8
    q = jax.random.normal(kq, (S, d_model), dtype=jnp.float32)
    k = jax.random.normal(kk, (S, d_model), dtype=jnp.float32)
    v = jax.random.normal(kv, (S, d_model), dtype=jnp.float32)

    out = attention(q, k, v, wq_t, wk_t, wv_t, d_head=d_head, masked=False)
    out = jax.block_until_ready(out)
    ref = _reference(q, k, v, wq_t, wk_t, wv_t, d_head=d_head, masked=False)
    assert out.shape == (S, d_head)
    assert jnp.allclose(out, ref, atol=2e-3, rtol=2e-3)

    out_m = attention(q, k, v, wq_t, wk_t, wv_t, d_head=d_head, masked=True)
    out_m = jax.block_until_ready(out_m)
    ref_m = _reference(q, k, v, wq_t, wk_t, wv_t, d_head=d_head, masked=True)
    assert jnp.allclose(out_m, ref_m, atol=2e-3, rtol=2e-3)

    # --- multi-tile key grid path (exercises accumulation + per-tile mask) ---
    S2 = 256
    kq2, kk2, kv2 = jax.random.split(jax.random.PRNGKey(1), 3)
    q2 = jax.random.normal(kq2, (S2, d_model), dtype=jnp.float32)
    k2 = jax.random.normal(kk2, (S2, d_model), dtype=jnp.float32)
    v2 = jax.random.normal(kv2, (S2, d_model), dtype=jnp.float32)
    out2 = attention(q2, k2, v2, wq_t, wk_t, wv_t, d_head=d_head, masked=True,
                     block_k=64)
    out2 = jax.block_until_ready(out2)
    ref2 = _reference(q2, k2, v2, wq_t, wk_t, wv_t, d_head=d_head, masked=True)
    assert jnp.allclose(out2, ref2, atol=2e-3, rtol=2e-3)

    print("KERNEL_OK")
</pallas_src>

<mosaic_0001>
module attributes {stable_mosaic.version = 11 : i64} {
  func.func @_attention_kernel(%arg0: i32, %arg1: memref<8x32xf32, #tpu.memory_space<vmem>>, %arg2: memref<8x32xf32, #tpu.memory_space<vmem>>, %arg3: memref<8x32xf32, #tpu.memory_space<vmem>>, %arg4: memref<32x128xf32, #tpu.memory_space<vmem>>, %arg5: memref<32x128xf32, #tpu.memory_space<vmem>>, %arg6: memref<32x128xf32, #tpu.memory_space<vmem>>, %arg7: memref<8x128xf32, #tpu.memory_space<vmem>>, %arg8: memref<8x128xf32, #tpu.memory_space<vmem>>, %arg9: memref<8x128xf32, #tpu.memory_space<vmem>>) attributes {dimension_semantics = [#tpu.dimension_semantics<arbitrary>], iteration_bounds = array<i64: 1>, scalar_prefetch = 0 : i64, scratch_operands = 2 : i64, tpu.core_type = #tpu.core_type<tc>, window_params = [{pipeline_mode = #tpu.pipeline_mode<synchronous>, transform_indices = @transform_0, window_bounds = array<i64: 8, 32>}, {transform_indices = @transform_1, window_bounds = array<i64: 8, 32>}, {transform_indices = @transform_2, window_bounds = array<i64: 8, 32>}, {pipeline_mode = #tpu.pipeline_mode<synchronous>, transform_indices = @transform_3, window_bounds = array<i64: 32, 128>}, {pipeline_mode = #tpu.pipeline_mode<synchronous>, transform_indices = @transform_4, window_bounds = array<i64: 32, 128>}, {pipeline_mode = #tpu.pipeline_mode<synchronous>, transform_indices = @transform_5, window_bounds = array<i64: 32, 128>}, {pipeline_mode = #tpu.pipeline_mode<synchronous>, transform_indices = @transform_6, window_bounds = array<i64: 8, 128>}]} {
    %c0_i32 = arith.constant 0 : i32
    %0 = arith.cmpi eq, %arg0, %c0_i32 : i32
    %1 = arith.extui %0 : i1 to i32
    %c0_i32_0 = arith.constant 0 : i32
    %2 = arith.cmpi ne, %1, %c0_i32_0 : i32
    scf.if %2 {
      %c0_21 = arith.constant 0 : index
      %c0_22 = arith.constant 0 : index
      %28 = vector.load %arg1[%c0_21, %c0_22] : memref<8x32xf32, #tpu.memory_space<vmem>>, vector<8x32xf32>
      %c0_23 = arith.constant 0 : index
      %c0_24 = arith.constant 0 : index
      %29 = vector.load %arg4[%c0_23, %c0_24] : memref<32x128xf32, #tpu.memory_space<vmem>>, vector<32x128xf32>
      %cst_25 = arith.constant dense<0.000000e+00> : vector<8x128xf32>
      %30 = tpu.matmul %28, %29, %cst_25 {dimension_numbers = #tpu.dot_dimension_numbers<[1], [0], [0], [1], [0, 0, 1, 1], [], []>} : vector<8x32xf32>, vector<32x128xf32>, vector<8x128xf32> -> vector<8x128xf32>
      %cst_26 = arith.constant 0.353553385 : f32
      %31 = vector.broadcast %cst_26 : f32 to vector<8x128xf32>
      %32 = arith.mulf %30, %31 : vector<8x128xf32>
      %c0_27 = arith.constant 0 : index
      %c0_28 = arith.constant 0 : index
      %33 = vector.load %arg8[%c0_27, %c0_28] : memref<8x128xf32, #tpu.memory_space<vmem>>, vector<8x128xf32>
      tpu.vector_store %arg8[%c0_27, %c0_28], %32 {strides = array<i32>} : memref<8x128xf32, #tpu.memory_space<vmem>>, vector<8x128xf32>,
      %cst_29 = arith.constant 0.000000e+00 : f32
      %34 = vector.broadcast %cst_29 : f32 to vector<8x128xf32>
      %c0_30 = arith.constant 0 : index
      %c0_31 = arith.constant 0 : index
      %35 = vector.load %arg9[%c0_30, %c0_31] : memref<8x128xf32, #tpu.memory_space<vmem>>, vector<8x128xf32>
      tpu.vector_store %arg9[%c0_30, %c0_31], %34 {strides = array<i32>} : memref<8x128xf32, #tpu.memory_space<vmem>>, vector<8x128xf32>,
    } else {
    }
    %c0 = arith.constant 0 : index
    %c0_1 = arith.constant 0 : index
    %3 = vector.load %arg2[%c0, %c0_1] : memref<8x32xf32, #tpu.memory_space<vmem>>, vector<8x32xf32>
    %c0_2 = arith.constant 0 : index
    %c0_3 = arith.constant 0 : index
    %4 = vector.load %arg5[%c0_2, %c0_3] : memref<32x128xf32, #tpu.memory_space<vmem>>, vector<32x128xf32>
    %cst = arith.constant dense<0.000000e+00> : vector<8x128xf32>
    %5 = tpu.matmul %3, %4, %cst {dimension_numbers = #tpu.dot_dimension_numbers<[1], [0], [0], [1], [0, 0, 1, 1], [], []>} : vector<8x32xf32>, vector<32x128xf32>, vector<8x128xf32> -> vector<8x128xf32>
    %c0_4 = arith.constant 0 : index
    %c0_5 = arith.constant 0 : index
    %6 = vector.load %arg3[%c0_4, %c0_5] : memref<8x32xf32, #tpu.memory_space<vmem>>, vector<8x32xf32>
    %c0_6 = arith.constant 0 : index
    %c0_7 = arith.constant 0 : index
    %7 = vector.load %arg6[%c0_6, %c0_7] : memref<32x128xf32, #tpu.memory_space<vmem>>, vector<32x128xf32>
    %cst_8 = arith.constant dense<0.000000e+00> : vector<8x128xf32>
    %8 = tpu.matmul %6, %7, %cst_8 {dimension_numbers = #tpu.dot_dimension_numbers<[1], [0], [0], [1], [0, 0, 1, 1], [], []>} : vector<8x32xf32>, vector<32x128xf32>, vector<8x128xf32> -> vector<8x128xf32>
    %c0_9 = arith.constant 0 : index
    %c0_10 = arith.constant 0 : index
    %9 = vector.load %arg8[%c0_9, %c0_10] : memref<8x128xf32, #tpu.memory_space<vmem>>, vector<8x128xf32>
    %cst_11 = arith.constant dense<0.000000e+00> : vector<8x8xf32>
    %10 = tpu.matmul %9, %5, %cst_11 {dimension_numbers = #tpu.dot_dimension_numbers<[1], [1], [0], [0], [0, 0, 1, 0], [], []>} : vector<8x128xf32>, vector<8x128xf32>, vector<8x8xf32> -> vector<8x8xf32>
    %cst_12 = arith.constant dense<0xFF800000> : vector<8xf32>
    %11 = vector.multi_reduction <maximumf>, %10, %cst_12 [0] : vector<8x8xf32> to vector<8xf32>
    %12 = vector.shape_cast %11 : vector<8xf32> to vector<1x8xf32>
    %13 = vector.broadcast %12 : vector<1x8xf32> to vector<8x8xf32>
    %14 = arith.subf %10, %13 : vector<8x8xf32>
    %15 = math.exp %14 : vector<8x8xf32>
    %cst_13 = arith.constant dense<0.000000e+00> : vector<8xf32>
    %16 = vector.multi_reduction <add>, %15, %cst_13 [0] : vector<8x8xf32> to vector<8xf32>
    %17 = vector.shape_cast %16 : vector<8xf32> to vector<1x8xf32>
    %18 = tpu.reciprocal %17 {approx = true} : vector<1x8xf32> -> vector<1x8xf32>
    %19 = vector.broadcast %18 : vector<1x8xf32> to vector<8x8xf32>
    %20 = arith.mulf %15, %19 : vector<8x8xf32>
    %c0_14 = arith.constant 0 : index
    %c0_15 = arith.constant 0 : index
    %21 = vector.load %arg9[%c0_14, %c0_15] : memref<8x128xf32, #tpu.memory_space<vmem>>, vector<8x128xf32>
    %cst_16 = arith.constant dense<0.000000e+00> : vector<8x128xf32>
    %22 = tpu.matmul %20, %8, %cst_16 {dimension_numbers = #tpu.dot_dimension_numbers<[1], [0], [0], [1], [0, 0, 1, 1], [], []>} : vector<8x8xf32>, vector<8x128xf32>, vector<8x128xf32> -> vector<8x128xf32>
    %23 = arith.addf %21, %22 : vector<8x128xf32>
    %c0_17 = arith.constant 0 : index
    %c0_18 = arith.constant 0 : index
    %24 = vector.load %arg9[%c0_17, %c0_18] : memref<8x128xf32, #tpu.memory_space<vmem>>, vector<8x128xf32>
    tpu.vector_store %arg9[%c0_17, %c0_18], %23 {strides = array<i32>} : memref<8x128xf32, #tpu.memory_space<vmem>>, vector<8x128xf32>,
    %c0_i32_19 = arith.constant 0 : i32
    %25 = arith.cmpi eq, %arg0, %c0_i32_19 : i32
    %26 = arith.extui %25 : i1 to i32
    %c0_i32_20 = arith.constant 0 : i32
    %27 = arith.cmpi ne, %26, %c0_i32_20 : i32
    scf.if %27 {
      %c0_21 = arith.constant 0 : index
      %c0_22 = arith.constant 0 : index
      %28 = vector.load %arg9[%c0_21, %c0_22] : memref<8x128xf32, #tpu.memory_space<vmem>>, vector<8x128xf32>
      %c0_23 = arith.constant 0 : index
      %c0_24 = arith.constant 0 : index
      %29 = vector.load %arg7[%c0_23, %c0_24] : memref<8x128xf32, #tpu.memory_space<vmem>>, vector<8x128xf32>
      tpu.vector_store %arg7[%c0_23, %c0_24], %28 {strides = array<i32>} : memref<8x128xf32, #tpu.memory_space<vmem>>, vector<8x128xf32>,
    } else {
    }
    return
  }
  func.func @transform_0(%arg0: i32) -> (i32, i32) {
    %c0_i32 = arith.constant 0 : i32
    %c0_i32_0 = arith.constant 0 : i32
    %c0_i32_1 = arith.constant 0 : i32
    return %c0_i32, %c0_i32_0 : i32, i32
  }
  func.func @transform_1(%arg0: i32) -> (i32, i32) {
    %c0_i32 = arith.constant 0 : i32
    %c0_i32_0 = arith.constant 0 : i32
    return %arg0, %c0_i32 : i32, i32
  }
  func.func @transform_2(%arg0: i32) -> (i32, i32) {
    %c0_i32 = arith.constant 0 : i32
    %c0_i32_0 = arith.constant 0 : i32
    return %arg0, %c0_i32 : i32, i32
  }
  func.func @transform_3(%arg0: i32) -> (i32, i32) {
    %c0_i32 = arith.constant 0 : i32
    %c0_i32_0 = arith.constant 0 : i32
    %c0_i32_1 = arith.constant 0 : i32
    return %c0_i32, %c0_i32_0 : i32, i32
  }
  func.func @transform_4(%arg0: i32) -> (i32, i32) {
    %c0_i32 = arith.constant 0 : i32
    %c0_i32_0 = arith.constant 0 : i32
    %c0_i32_1 = arith.constant 0 : i32
    return %c0_i32, %c0_i32_0 : i32, i32
  }
  func.func @transform_5(%arg0: i32) -> (i32, i32) {
    %c0_i32 = arith.constant 0 : i32
    %c0_i32_0 = arith.constant 0 : i32
    %c0_i32_1 = arith.constant 0 : i32
    return %c0_i32, %c0_i32_0 : i32, i32
  }
  func.func @transform_6(%arg0: i32) -> (i32, i32) {
    %c0_i32 = arith.constant 0 : i32
    %c0_i32_0 = arith.constant 0 : i32
    %c0_i32_1 = arith.constant 0 : i32
    return %c0_i32, %c0_i32_0 : i32, i32
  }
}

</mosaic_0001>

<bundles_post_ra>
// kernel: tpu_custom_call.1
= control target key start
LH: loop header
LB: loop body
LE: loop exit
PB: predicated region body
PF: predicated region fallthrough
CT: control target
= control target key end

     0   :  { %11 = vsyncpa [#allocation5], 0  ;;  %s563_s0 = inlined_call_operand.hbm [shape: f32[8,32], index: 0, kind: input, shape index: {}]   ;;  %s564_s1 = inlined_call_operand.hbm [shape: f32[8,32], index: 1, kind: input, shape index: {}]   ;;  %s565_s2 = inlined_call_operand.hbm [shape: f32[8,32], index: 2, kind: input, shape index: {}]   ;;  %s566_s3 = inlined_call_operand.hbm [shape: f32[32,128], index: 3, kind: input, shape index: {}]   ;;  %s567_s4 = inlined_call_operand.hbm [shape: f32[32,128], index: 4, kind: input, shape index: {}]   ;;  %s568_s5 = inlined_call_operand.hbm [shape: f32[32,128], index: 5, kind: input, shape index: {}]   ;;  %s569_s6 = inlined_call_operand.hbm [shape: f32[8,128], index: 6, kind: output, shape index: {}]  }
   0x1   :  { %12 = vsyncpa [#allocation8], 0 }
   0x2   :  { %13 = vsyncpa [#allocation11], 0 }
   0x3   :  { %14 = vsyncpa [#allocation14], 0  ;;  %s32_s23 = sshll.u32 %s564_s1, 4  ;;  %s33_s23 = int_to_ptr.hbm [resolvable:$true] %s32_s23 }
   0x4   :  { %15 = vsyncpa [#allocation6], 0  ;;  %s492_s24 = smov [#allocation7]   ;;  %s53_s28 = sshll.u32 %s566_s3, 4  ;;  %s54_s28 = int_to_ptr.hbm [resolvable:$true] %s53_s28 }
   0x5   :  { %s34_s25 = sshll.u32 %s492_s24, 4  ;;  %s493_s29 = smov [#allocation10]   ;;  %s35_s25 = int_to_ptr.vmem [resolvable:$true] %s34_s25 }
   0x6   :  { %37 = dma.hbm_to_vmem [thread:$0]  %s33_s23, 128, %s35_s25, [#allocation8]  }
   0x7   :  { %s55_s30 = sshll.u32 %s493_s29, 4  ;;  %s494_s7 = smov 128   ;;  %s56_s30 = int_to_ptr.vmem [resolvable:$true] %s55_s30 }
   0x8   :  { %s495_s8 = smov 8   ;;  %s21_s1 = sshll.u32 %s563_s0, 4  ;;  %s22_s1 = int_to_ptr.hbm [resolvable:$true] %s21_s1 }
   0x9   :  { %61 = dma.hbm_to_vmem [thread:$0]  %s54_s28, 512, %s56_s30, [#allocation11], %s494_s7, %s494_s7, %s495_s8  }
   0xa   :  { %s496_s11 = smov [#allocation4]   ;;  %s43_s3 = sshll.u32 %s565_s2, 4  ;;  %s44_s3 = int_to_ptr.hbm [resolvable:$true] %s43_s3 }
   0xb   :  { %s23_s12 = sshll.u32 %s496_s11, 4  ;;  %s497_s15 = smov [#allocation9]   ;;  %s24_s12 = int_to_ptr.vmem [resolvable:$true] %s23_s12 }
   0xc   :  { %26 = dma.hbm_to_vmem [thread:$0]  %s22_s1, 128, %s24_s12, [#allocation5]  }
   0xd   :  { %s45_s16 = sshll.u32 %s497_s15, 4  ;;  %s66_s19 = sshll.u32 %s567_s4, 4  ;;  %s46_s16 = int_to_ptr.vmem [resolvable:$true] %s45_s16  ;;  %s67_s19 = int_to_ptr.hbm [resolvable:$true] %s66_s19 }
   0xe   :  { %48 = dma.hbm_to_vmem [thread:$0]  %s44_s3, 128, %s46_s16, [#allocation8]  }
   0xf   :  { %s79_s21 = sshll.u32 %s568_s5, 4  ;;  %s498_s22 = smov [#allocation12]   ;;  %s80_s21 = int_to_ptr.hbm [resolvable:$true] %s79_s21 }
  0x10   :  { %s68_s23 = sshll.u32 %s498_s22, 4  ;;  %s499_s2 = smov [#allocation13]   ;;  %s69_s23 = int_to_ptr.vmem [resolvable:$true] %s68_s23 }
  0x11   :  { %74 = dma.hbm_to_vmem [thread:$0]  %s67_s19, 512, %s69_s23, [#allocation11], %s494_s7, %s494_s7, %s495_s8  }
  0x12   :  { %s81_s24 = sshll.u32 %s499_s2, 4  ;;  %s82_s24 = int_to_ptr.vmem [resolvable:$true] %s81_s24 }
  0x13   :  { %87 = dma.hbm_to_vmem [thread:$0]  %s80_s21, 512, %s82_s24, [#allocation14], %s494_s7, %s494_s7, %s495_s8  }
  0x14   :  { %482 = dma.done.wait [#allocation5], 128  }
  0x15   :  { %483 = vsyncadd [#allocation5], 4294967168 }
  0x16   :  { %484 = dma.done.wait [#allocation8], 256  }
  0x17   :  { %485 = vsyncadd [#allocation8], 4294967040 }
  0x18   :  { %486 = dma.done.wait [#allocation11], 1024  }
  0x19   :  { %487 = vsyncadd [#allocation11], 4294966272 }
  0x1a   :  { %488 = dma.done.wait [#allocation14], 512  }
  0x1b   :  { %489 = vsyncadd [#allocation14], 4294966784  ;;  %v152_v0 = vld [vmem:[#allocation12 + $0x18] sm:$0xff]  ;;  %v151_v2 = vld [vmem:[#allocation12 + $0x10] sm:$0xff]  ;;  %vm121_vm0 = vcmask 261120   ;;  %vm226_vm1 = vcmask 64512  }
  0x1c   :  { %v120_v1 = vld [vmem:[#allocation10 + $0x18] sm:$0xff]  ;;  %169 = vmatpush.msra.mxu1 %v152_v0  ;;  %v119_v3 = vld [vmem:[#allocation10 + $0x10] sm:$0xff]  ;;  %v150_v4 = vld [vmem:[#allocation12 + $0x8] sm:$0xff]  ;;  %s500_s4 = smov [#allocation15]   ;;  %s284_s27 = sshll.u32 %s569_s6, 4  ;;  %s285_s27 = int_to_ptr.hbm [resolvable:$true] %s284_s27 }
  0x1d   :  { %137 = vmatpush.msra.mxu0 %v120_v1  ;;  %v118_v5 = vld [vmem:[#allocation10 + $0x8] sm:$0xff]  ;;  %v149_v6 = vld [vmem:[#allocation12] sm:$0xff]  ;;  %v148_v8 = vld [vmem:[#allocation7] sm:$0xff]  ;;  %s282_s5 = sshll.u32 %s500_s4, 4  ;;  %s283_s5 = int_to_ptr.vmem [resolvable:$true] %s282_s5 }
  0x1e   :  { %170 = vmatpush.msra.mxu1 %v151_v2  ;;  %v117_v7 = vld [vmem:[#allocation10] sm:$0xff]  ;;  %v116_v9 = vld [vmem:[#allocation4] sm:$0xff]  ;;  %v181_v10 = vld [vmem:[#allocation13 + $0x18] sm:$0xff] }
  0x1f   :  { %138 = vmatpush.msra.mxu0 %v119_v3  ;;  %v180_v11 = vld [vmem:[#allocation13 + $0x10] sm:$0xff]  ;;  %197 = vmatpush.msra.mxu2 %v181_v10  ;;  %v179_v12 = vld [vmem:[#allocation13 + $0x8] sm:$0xff]  ;;  %v178_v13 = vld [vmem:[#allocation13] sm:$0xff] }
  0x20   :  { %171 = vmatpush.msra.mxu1 %v150_v4  ;;  %v177_v14 = vld [vmem:[#allocation9] sm:$0xff] }
  0x21   :  { %139 = vmatpush.msra.mxu0 %v118_v5  ;;  %198 = vmatpush.msra.mxu2 %v180_v11 }
  0x22   :  { %172 = vmatpush.msra.mxu1 %v149_v6 }
  0x23   :  { %140 = vmatpush.msra.mxu0 %v117_v7  ;;  %298 = vmatmul.msk.f32.vlgmr.msra.gmra.mxu1 %vm121_vm0, %v148_v8 }
  0x24   :  { %297 = vmatmul.msk.f32.vlgmr.msra.gmra.mxu0 %vm121_vm0, %v116_v9  ;;  %199 = vmatpush.msra.mxu2 %v179_v12 }
  0x26   :  { %200 = vmatpush.msra.mxu2 %v178_v13 }
  0x27   :  { %299 = vmatmul.msk.f32.vlgmr.msra.gmra.mxu2 %vm121_vm0, %v177_v14 }
  0xa0   :  { %v174_v15 = vpop.f32.mrf.mxu1 }
  0xa1   :  { %v142_v16 = vpop.f32.mrf.mxu0  ;;  %221 = vmatpush.xpose.msra.mxu3 %v174_v15 }
  0xa2   :  { %v145_v17 = vmul.f32 0.35355338, %v142_v16 }
  0xa4   :  { %222 = vmatmul.f32.vlgmr.msra.gmra.mxu3 %v145_v17 }
  0xaa   :  { %v202_v23 = vpop.f32.mrf.mxu2 }
  0xab   :  { %265 = vmatpush.msrb.mxu3 %v202_v23 }
 0x127   :  { %v223_v18 = vpop.f32.mrf.mxu3 }
 0x128   :  { %v227_v19 = vsel %vm226_vm1, %v223_v18, -inf }
 0x129   :  { %v228_v20 = vrot.slane %v227_v19, 4 }
 0x12b   :  { %v229_v21 = vmax.f32 %v227_v19, %v228_v20 }
 0x12d   :  { %v230_v22 = vrot.slane %v229_v21, 2 }
 0x12f   :  { %v231_v24 = vmax.f32 %v229_v21, %v230_v22 }
 0x131   :  { %v232_v25 = vrot.slane %v231_v24, 1 }
 0x133   :  { %v233_v26 = vmax.f32 %v231_v24, %v232_v25 }
 0x135   :  { %v234_v27 = vsub.f32 %v223_v18, %v233_v26 }
 0x137   :  { %v235_v28 = vmul.f32 1.442695, %v234_v27 }
 0x139   :  { %310 = vpow2.f32 %v235_v28 }
 0x13f   :  { %v311_v29 = vpop.eup %310 }
 0x140   :  { %v237_v30 = vsel %vm226_vm1, %v311_v29, 0.0 }
 0x141   :  { %v238_v31 = vrot.slane %v237_v30, 4 }
 0x143   :  { %v239_v32 = vadd.f32 %v238_v31, %v237_v30 }
 0x145   :  { %v240_v33 = vrot.slane %v239_v32, 2 }
 0x147   :  { %v241_v34 = vadd.f32 %v240_v33, %v239_v32 }
 0x149   :  { %v242_v35 = vrot.slane %v241_v34, 1 }
 0x14b   :  { %v243_v36 = vadd.f32 %v242_v35, %v241_v34 }
 0x14d   :  { %312 = vrcp.f32 %v243_v36 }
 0x153   :  { %v313_v37 = vpop.eup %312 }
 0x154   :  { %v245_v38 = vmul.f32 %v313_v37, %v311_v29 }
 0x156   :  { %300 = vmatmul.msk.f32.vlgmr.msrb.gmra.mxu3 %vm226_vm1, %v245_v38 }
 0x1d9   :  { %v267_v39 = vpop.f32.mrf.mxu3 }
 0x1da   :  { %276 = vst [vmem:[#allocation15] sm:$0xff] %v267_v39 }
 0x1db   :  { %287 = dma.vmem_to_hbm [thread:$0]  %s283_s5, 128, %s285_s27, [#allocation6]  }
 0x1dc   :  { %490 = dma.done.wait [#allocation6], 128  }
 0x1dd   :  { %491 = vsyncadd [#allocation6], 4294967168 }
 0x1de   :  { %292 = vsyncpa [#allocation5], 1 }
 0x1df   :  { %293 = vsyncpa [#allocation8], 1 }
 0x1e0   :  { %294 = vsyncpa [#allocation11], 1 }
 0x1e1   :  { %295 = vsyncpa [#allocation14], 1 }
 0x1e2   :  { %296 = vsyncpa [#allocation6], 1 }

</bundles_post_ra>
